<compile_context>
chip_gen: v5e
topology: v5e:2x2
jax: 0.10.0
libtpu: 0.0.40
codegen_flags: <defaults>
</compile_context>

<pallas_src>
import functools

import jax
import jax.numpy as jnp
from jax.experimental import pallas as pl
from jax.experimental.pallas import tpu as pltpu


_LAYER_DIMS = [(384, 256), (256, 128), (128, 64), (64, 32), (32, 2)]


def _round_up(x, m):
    return (x + m - 1) // m * m


def mlp_kernel(x_ref, w1_ref, w2_ref, w3_ref, w4_ref, wd_ref, b_ref, o_ref):
    """Fused 5-layer MLP + softmax for one (TB, 384) batch tile."""
    # Cast activations to bf16 once; accumulate every matmul in f32.
    h = x_ref[...].astype(jnp.bfloat16)

    def dense_relu(h_in, w_ref, bias):
        y = jnp.dot(h_in, w_ref[...], preferred_element_type=jnp.float32)
        return jnp.maximum(y + bias, 0.0)

    h = dense_relu(h, w1_ref, b_ref[0:1, 0:256]).astype(jnp.bfloat16)
    h = dense_relu(h, w2_ref, b_ref[1:2, 0:128]).astype(jnp.bfloat16)
    h = dense_relu(h, w3_ref, b_ref[2:3, 0:64]).astype(jnp.bfloat16)
    h = dense_relu(h, w4_ref, b_ref[3:4, 0:32])        # (TB, 32) f32 for tail

    # Final Linear(32->2) + Softmax folded into one VPU dot product + sigmoid:
    #   diff = (x @ w5 + b5)[:,1] - (x @ w5 + b5)[:,0]
    diff = jnp.sum(h * wd_ref[...], axis=-1, keepdims=True) + b_ref[4:5, 0:1]

    p1 = 1.0 / (1.0 + jnp.exp(-diff))   # softmax over 2 classes == sigmoid
    p0 = 1.0 - p1

    lane = jax.lax.broadcasted_iota(jnp.int32, (h.shape[0], 2), 1)
    o_ref[...] = jnp.where(lane == 0, p0, p1).astype(o_ref.dtype)


def prepare_params(params):
    """Convert (W_t (in,out) f32, b (out,) f32) pairs into kernel operands."""
    (w1, b1), (w2, b2), (w3, b3), (w4, b4), (w5, b5) = params

    w1b, w2b, w3b, w4b = (w.astype(jnp.bfloat16) for w in (w1, w2, w3, w4))

    # Fold the final layer + softmax into a logit-difference vector / scalar.
    wd = (w5[:, 1] - w5[:, 0]).astype(jnp.float32).reshape(1, 32)
    bd = (b5[1] - b5[0]).astype(jnp.float32)

    # One lane-aligned bias buffer: row r holds layer r's bias, zero padded.
    bias = jnp.zeros((5, 256), jnp.float32)
    bias = bias.at[0, :256].set(b1)
    bias = bias.at[1, :128].set(b2)
    bias = bias.at[2, :64].set(b3)
    bias = bias.at[3, :32].set(b4)
    bias = bias.at[4, 0].set(bd)

    return (w1b, w2b, w3b, w4b, wd, bias)


@functools.partial(jax.jit, static_argnames=("tb",))
def net_forward(x, kernel_params, *, tb=256):
    B, F = x.shape
    assert F == 384, F

    # Batch tile: multiple of 8 (f32 sublane); up to `tb` rows per grid step.
    TB = min(tb, _round_up(max(B, 8), 8))
    Bp = _round_up(B, TB)
    if Bp != B:
        x = jnp.pad(x, ((0, Bp - B), (0, 0)))

    w1, w2, w3, w4, wd, bias = kernel_params

    resident = lambda i: (0, 0)     # weights/biases stay VMEM-resident
    batched = lambda i: (i, 0)      # per-step batch tile

    out = pl.pallas_call(
        mlp_kernel,
        out_shape=jax.ShapeDtypeStruct((Bp, 2), jnp.float32),
        grid=(Bp // TB,),
        in_specs=[
            pl.BlockSpec((TB, 384), batched),
            pl.BlockSpec(w1.shape, resident),
            pl.BlockSpec(w2.shape, resident),
            pl.BlockSpec(w3.shape, resident),
            pl.BlockSpec(w4.shape, resident),
            pl.BlockSpec(wd.shape, resident),
            pl.BlockSpec(bias.shape, resident),
        ],
        out_specs=pl.BlockSpec((TB, 2), batched),
        compiler_params=pltpu.CompilerParams(
            dimension_semantics=("parallel",)),
    )(x, w1, w2, w3, w4, wd, bias)

    return out[:B]


def init_params(key):
    # PyTorch nn.Linear default init: U(-1/sqrt(fan_in), 1/sqrt(fan_in)).
    params = []
    for (fan_in, fan_out) in _LAYER_DIMS:
        key, kw, kb = jax.random.split(key, 3)
        bound = 1.0 / (fan_in ** 0.5)
        w_t = jax.random.uniform(kw, (fan_in, fan_out), jnp.float32,
                                 minval=-bound, maxval=bound)
        b = jax.random.uniform(kb, (fan_out,), jnp.float32,
                               minval=-bound, maxval=bound)
        params.append((w_t, b))
    return params


def reference_forward(x, params):
    h = x
    for i, (w, b) in enumerate(params):
        h = h @ w + b
        if i < len(params) - 1:
            h = jnp.maximum(h, 0.0)
    return jax.nn.softmax(h, axis=-1)


if __name__ == "__main__":
    key = jax.random.PRNGKey(0)
    key, kx = jax.random.split(key)

    B = 8  # small batch for the demo
    x = jax.random.normal(kx, (B, 384), jnp.float32)
    params = init_params(key)
    kernel_params = prepare_params(params)

    out = jax.block_until_ready(net_forward(x, kernel_params))
    assert out.shape == (B, 2), out.shape

    # Reference with the same bf16-quantized hidden-layer weights the kernel
    # uses (f32 activations); remaining delta is bf16 activation rounding.
    qparams = [((w.astype(jnp.bfloat16).astype(jnp.float32) if i < 4 else w), b)
               for i, (w, b) in enumerate(params)]
    ref = reference_forward(x, qparams)

    assert jnp.allclose(jnp.sum(out, axis=-1), 1.0, atol=1e-5)
    assert jnp.allclose(out, ref, atol=2e-2), (
        f"max diff {float(jnp.max(jnp.abs(out - ref)))}")

    print("KERNEL_OK")
</pallas_src>

<mosaic_0001>
module attributes {stable_mosaic.version = 11 : i64} {
  func.func @mlp_kernel(%arg0: i32, %arg1: memref<8x384xf32, #tpu.memory_space<vmem>>, %arg2: memref<384x256xbf16, #tpu.memory_space<vmem>>, %arg3: memref<256x128xbf16, #tpu.memory_space<vmem>>, %arg4: memref<128x64xbf16, #tpu.memory_space<vmem>>, %arg5: memref<64x32xbf16, #tpu.memory_space<vmem>>, %arg6: memref<1x32xf32, #tpu.memory_space<vmem>>, %arg7: memref<5x256xf32, #tpu.memory_space<vmem>>, %arg8: memref<8x2xf32, #tpu.memory_space<vmem>>) attributes {dimension_semantics = [#tpu.dimension_semantics<parallel>], iteration_bounds = array<i64: 1>, scalar_prefetch = 0 : i64, scratch_operands = 0 : i64, tpu.core_type = #tpu.core_type<tc>, window_params = [{transform_indices = @transform_0, window_bounds = array<i64: 8, 384>}, {pipeline_mode = #tpu.pipeline_mode<synchronous>, transform_indices = @transform_1, window_bounds = array<i64: 384, 256>}, {pipeline_mode = #tpu.pipeline_mode<synchronous>, transform_indices = @transform_2, window_bounds = array<i64: 256, 128>}, {pipeline_mode = #tpu.pipeline_mode<synchronous>, transform_indices = @transform_3, window_bounds = array<i64: 128, 64>}, {pipeline_mode = #tpu.pipeline_mode<synchronous>, transform_indices = @transform_4, window_bounds = array<i64: 64, 32>}, {pipeline_mode = #tpu.pipeline_mode<synchronous>, transform_indices = @transform_5, window_bounds = array<i64: 1, 32>}, {pipeline_mode = #tpu.pipeline_mode<synchronous>, transform_indices = @transform_6, window_bounds = array<i64: 5, 256>}, {transform_indices = @transform_7, window_bounds = array<i64: 8, 2>}]} {
    %c0 = arith.constant 0 : index
    %c0_0 = arith.constant 0 : index
    %0 = vector.load %arg1[%c0, %c0_0] : memref<8x384xf32, #tpu.memory_space<vmem>>, vector<8x384xf32>
    %1 = arith.truncf %0 : vector<8x384xf32> to vector<8x384xbf16>
    %c0_1 = arith.constant 0 : index
    %c0_2 = arith.constant 0 : index
    %2 = vector.load %arg7[%c0_1, %c0_2] : memref<5x256xf32, #tpu.memory_space<vmem>>, vector<1x256xf32>
    %c0_3 = arith.constant 0 : index
    %c0_4 = arith.constant 0 : index
    %3 = vector.load %arg2[%c0_3, %c0_4] : memref<384x256xbf16, #tpu.memory_space<vmem>>, vector<384x256xbf16>
    %cst = arith.constant dense<0.000000e+00> : vector<8x256xf32>
    %4 = tpu.matmul %1, %3, %cst {dimension_numbers = #tpu.dot_dimension_numbers<[1], [0], [0], [1], [0, 0, 1, 1], [], []>} : vector<8x384xbf16>, vector<384x256xbf16>, vector<8x256xf32> -> vector<8x256xf32>
    %5 = vector.broadcast %2 : vector<1x256xf32> to vector<8x256xf32>
    %6 = arith.addf %4, %5 : vector<8x256xf32>
    %cst_5 = arith.constant 0.000000e+00 : f32
    %7 = vector.broadcast %cst_5 : f32 to vector<8x256xf32>
    %8 = arith.maximumf %6, %7 : vector<8x256xf32>
    %9 = arith.truncf %8 : vector<8x256xf32> to vector<8x256xbf16>
    %c1 = arith.constant 1 : index
    %c0_6 = arith.constant 0 : index
    %10 = vector.load %arg7[%c1, %c0_6] : memref<5x256xf32, #tpu.memory_space<vmem>>, vector<1x128xf32>
    %c0_7 = arith.constant 0 : index
    %c0_8 = arith.constant 0 : index
    %11 = vector.load %arg3[%c0_7, %c0_8] : memref<256x128xbf16, #tpu.memory_space<vmem>>, vector<256x128xbf16>
    %cst_9 = arith.constant dense<0.000000e+00> : vector<8x128xf32>
    %12 = tpu.matmul %9, %11, %cst_9 {dimension_numbers = #tpu.dot_dimension_numbers<[1], [0], [0], [1], [0, 0, 1, 1], [], []>} : vector<8x256xbf16>, vector<256x128xbf16>, vector<8x128xf32> -> vector<8x128xf32>
    %13 = vector.broadcast %10 : vector<1x128xf32> to vector<8x128xf32>
    %14 = arith.addf %12, %13 : vector<8x128xf32>
    %cst_10 = arith.constant 0.000000e+00 : f32
    %15 = vector.broadcast %cst_10 : f32 to vector<8x128xf32>
    %16 = arith.maximumf %14, %15 : vector<8x128xf32>
    %17 = arith.truncf %16 : vector<8x128xf32> to vector<8x128xbf16>
    %c2 = arith.constant 2 : index
    %c0_11 = arith.constant 0 : index
    %18 = vector.load %arg7[%c2, %c0_11] : memref<5x256xf32, #tpu.memory_space<vmem>>, vector<1x64xf32>
    %c0_12 = arith.constant 0 : index
    %c0_13 = arith.constant 0 : index
    %19 = vector.load %arg4[%c0_12, %c0_13] : memref<128x64xbf16, #tpu.memory_space<vmem>>, vector<128x64xbf16>
    %cst_14 = arith.constant dense<0.000000e+00> : vector<8x64xf32>
    %20 = tpu.matmul %17, %19, %cst_14 {dimension_numbers = #tpu.dot_dimension_numbers<[1], [0], [0], [1], [0, 0, 1, 1], [], []>} : vector<8x128xbf16>, vector<128x64xbf16>, vector<8x64xf32> -> vector<8x64xf32>
    %21 = vector.broadcast %18 : vector<1x64xf32> to vector<8x64xf32>
    %22 = arith.addf %20, %21 : vector<8x64xf32>
    %cst_15 = arith.constant 0.000000e+00 : f32
    %23 = vector.broadcast %cst_15 : f32 to vector<8x64xf32>
    %24 = arith.maximumf %22, %23 : vector<8x64xf32>
    %25 = arith.truncf %24 : vector<8x64xf32> to vector<8x64xbf16>
    %c3 = arith.constant 3 : index
    %c0_16 = arith.constant 0 : index
    %26 = vector.load %arg7[%c3, %c0_16] : memref<5x256xf32, #tpu.memory_space<vmem>>, vector<1x32xf32>
    %c0_17 = arith.constant 0 : index
    %c0_18 = arith.constant 0 : index
    %27 = vector.load %arg5[%c0_17, %c0_18] : memref<64x32xbf16, #tpu.memory_space<vmem>>, vector<64x32xbf16>
    %cst_19 = arith.constant dense<0.000000e+00> : vector<8x32xf32>
    %28 = tpu.matmul %25, %27, %cst_19 {dimension_numbers = #tpu.dot_dimension_numbers<[1], [0], [0], [1], [0, 0, 1, 1], [], []>} : vector<8x64xbf16>, vector<64x32xbf16>, vector<8x32xf32> -> vector<8x32xf32>
    %29 = vector.broadcast %26 : vector<1x32xf32> to vector<8x32xf32>
    %30 = arith.addf %28, %29 : vector<8x32xf32>
    %cst_20 = arith.constant 0.000000e+00 : f32
    %31 = vector.broadcast %cst_20 : f32 to vector<8x32xf32>
    %32 = arith.maximumf %30, %31 : vector<8x32xf32>
    %c0_21 = arith.constant 0 : index
    %c0_22 = arith.constant 0 : index
    %33 = vector.load %arg6[%c0_21, %c0_22] : memref<1x32xf32, #tpu.memory_space<vmem>>, vector<1x32xf32>
    %34 = vector.broadcast %33 : vector<1x32xf32> to vector<8x32xf32>
    %35 = arith.mulf %32, %34 : vector<8x32xf32>
    %cst_23 = arith.constant dense<0.000000e+00> : vector<8xf32>
    %36 = vector.multi_reduction <add>, %35, %cst_23 [1] : vector<8x32xf32> to vector<8xf32>
    %37 = vector.shape_cast %36 : vector<8xf32> to vector<8x1xf32>
    %c4 = arith.constant 4 : index
    %c0_24 = arith.constant 0 : index
    %38 = vector.load %arg7[%c4, %c0_24] : memref<5x256xf32, #tpu.memory_space<vmem>>, vector<1x1xf32>
    %39 = vector.broadcast %38 : vector<1x1xf32> to vector<8x1xf32>
    %40 = arith.addf %37, %39 : vector<8x1xf32>
    %cst_25 = arith.constant 0.000000e+00 : f32
    %41 = vector.broadcast %cst_25 : f32 to vector<8x1xf32>
    %42 = arith.subf %41, %40 : vector<8x1xf32>
    %43 = math.exp %42 : vector<8x1xf32>
    %cst_26 = arith.constant 1.000000e+00 : f32
    %44 = vector.broadcast %cst_26 : f32 to vector<8x1xf32>
    %45 = arith.addf %44, %43 : vector<8x1xf32>
    %cst_27 = arith.constant 1.000000e+00 : f32
    %46 = vector.broadcast %cst_27 : f32 to vector<8x1xf32>
    %47 = arith.divf %46, %45 : vector<8x1xf32>
    %cst_28 = arith.constant 1.000000e+00 : f32
    %48 = vector.broadcast %cst_28 : f32 to vector<8x1xf32>
    %49 = arith.subf %48, %47 : vector<8x1xf32>
    %50 = tpu.iota {dimensions = array<i32: 1>} : vector<8x2xi32>
    %c0_i32 = arith.constant 0 : i32
    %51 = vector.broadcast %c0_i32 : i32 to vector<8x2xi32>
    %52 = arith.cmpi eq, %50, %51 : vector<8x2xi32>
    %53 = vector.shape_cast %49 : vector<8x1xf32> to vector<8x1xf32>
    %54 = vector.broadcast %53 : vector<8x1xf32> to vector<8x2xf32>
    %55 = vector.shape_cast %47 : vector<8x1xf32> to vector<8x1xf32>
    %56 = vector.broadcast %55 : vector<8x1xf32> to vector<8x2xf32>
    %57 = arith.select %52, %54, %56 : vector<8x2xi1>, vector<8x2xf32>
    %c0_29 = arith.constant 0 : index
    %c0_30 = arith.constant 0 : index
    %58 = vector.load %arg8[%c0_29, %c0_30] : memref<8x2xf32, #tpu.memory_space<vmem>>, vector<8x2xf32>
    tpu.vector_store %arg8[%c0_29, %c0_30], %57 {strides = array<i32>} : memref<8x2xf32, #tpu.memory_space<vmem>>, vector<8x2xf32>,
    return
  }
  func.func @transform_0(%arg0: i32) -> (i32, i32) {
    %c0_i32 = arith.constant 0 : i32
    %c0_i32_0 = arith.constant 0 : i32
    return %arg0, %c0_i32 : i32, i32
  }
  func.func @transform_1(%arg0: i32) -> (i32, i32) {
    %c0_i32 = arith.constant 0 : i32
    %c0_i32_0 = arith.constant 0 : i32
    %c0_i32_1 = arith.constant 0 : i32
    return %c0_i32, %c0_i32_0 : i32, i32
  }
  func.func @transform_2(%arg0: i32) -> (i32, i32) {
    %c0_i32 = arith.constant 0 : i32
    %c0_i32_0 = arith.constant 0 : i32
    %c0_i32_1 = arith.constant 0 : i32
    return %c0_i32, %c0_i32_0 : i32, i32
  }
  func.func @transform_3(%arg0: i32) -> (i32, i32) {
    %c0_i32 = arith.constant 0 : i32
    %c0_i32_0 = arith.constant 0 : i32
    %c0_i32_1 = arith.constant 0 : i32
    return %c0_i32, %c0_i32_0 : i32, i32
  }
  func.func @transform_4(%arg0: i32) -> (i32, i32) {
    %c0_i32 = arith.constant 0 : i32
    %c0_i32_0 = arith.constant 0 : i32
    %c0_i32_1 = arith.constant 0 : i32
    return %c0_i32, %c0_i32_0 : i32, i32
  }
  func.func @transform_5(%arg0: i32) -> (i32, i32) {
    %c0_i32 = arith.constant 0 : i32
    %c0_i32_0 = arith.constant 0 : i32
    %c0_i32_1 = arith.constant 0 : i32
    return %c0_i32, %c0_i32_0 : i32, i32
  }
  func.func @transform_6(%arg0: i32) -> (i32, i32) {
    %c0_i32 = arith.constant 0 : i32
    %c0_i32_0 = arith.constant 0 : i32
    %c0_i32_1 = arith.constant 0 : i32
    return %c0_i32, %c0_i32_0 : i32, i32
  }
  func.func @transform_7(%arg0: i32) -> (i32, i32) {
    %c0_i32 = arith.constant 0 : i32
    %c0_i32_0 = arith.constant 0 : i32
    return %arg0, %c0_i32 : i32, i32
  }
}

</mosaic_0001>

<bundles_post_ra>
// kernel: net_forward.1
= control target key start
LH: loop header
LB: loop body
LE: loop exit
PB: predicated region body
PF: predicated region fallthrough
CT: control target
= control target key end

     0   :  { %12 = vsyncpa [#allocation3], 0  ;;  %s1356_s0 = inlined_call_operand.vmem [shape: f32[8,384], index: 0, kind: input, shape index: {}]   ;;  %s1357_s1 = inlined_call_operand.hbm [shape: bf16[384,256], index: 1, kind: input, shape index: {}]   ;;  %s1358_s2 = inlined_call_operand.hbm [shape: bf16[256,128], index: 2, kind: input, shape index: {}]   ;;  %s1359_s3 = inlined_call_operand.vmem [shape: bf16[128,64], index: 3, kind: input, shape index: {}]   ;;  %s1360_s4 = inlined_call_operand.vmem [shape: bf16[64,32], index: 4, kind: input, shape index: {}]   ;;  %s1361_s5 = inlined_call_operand.vmem [shape: f32[1,32], index: 5, kind: input, shape index: {}]   ;;  %s1362_s6 = inlined_call_operand.vmem [shape: f32[5,256], index: 6, kind: input, shape index: {}]   ;;  %s1363_s7 = inlined_call_operand.vmem [shape: f32[8,2], index: 7, kind: output, shape index: {}]  }
   0x1   :  { %s20_s26 = sshll.u32 %s1357_s1, 4  ;;  %s21_s26 = int_to_ptr.hbm [resolvable:$true] %s20_s26 }
   0x2   :  { %13 = vsyncpa [#allocation5], 0  ;;  %s1229_s27 = smov [#allocation2]   ;;  %s33_s8 = sshll.u32 %s1358_s2, 4  ;;  %s34_s8 = int_to_ptr.hbm [resolvable:$true] %s33_s8 }
   0x3   :  { %s22_s28 = sshll.u32 %s1229_s27, 4  ;;  %s1230_s9 = smov 128   ;;  %s23_s28 = int_to_ptr.vmem [resolvable:$true] %s22_s28 }
   0x4   :  { %s1231_s10 = smov 8   ;;  %s1232_s11 = smov [#allocation4]  }
   0x5   :  { %28 = dma.hbm_to_vmem [thread:$0]  %s21_s26, 6144, %s23_s28, [#allocation3], %s1230_s9, %s1230_s9, %s1231_s10  }
   0x6   :  { %s35_s12 = sshll.u32 %s1232_s11, 4  ;;  %s1233_s13 = smov 64   ;;  %s36_s12 = int_to_ptr.vmem [resolvable:$true] %s35_s12 }
   0x7   :  { %s1234_s14 = smov 4  }
   0x8   :  { %41 = dma.hbm_to_vmem [thread:$0]  %s34_s8, 2048, %s36_s12, [#allocation5], %s1233_s13, %s1233_s13, %s1234_s14  }
   0x9   :  { %1225 = dma.done.wait [#allocation3], 6144  }
   0xa   :  { %1226 = vsyncadd [#allocation3], 4294961152 }
   0xb   :  { %1227 = dma.done.wait [#allocation5], 2048  }
   0xc   :  { %1228 = vsyncadd [#allocation5], 4294965248  ;;  %v840_v0 = vld [vmem:[#allocation2 + $0x70] sm:$0xf]  ;;  %v1102_v1 = vld [vmem:[#allocation2 + $0x74] sm:$0xf0] }
   0xd   :  { %v904_v2 = vld [vmem:[#allocation2 + $0xf0] sm:$0xf]  ;;  %v841_v3 = vor.u32 %v1102_v1, %v840_v0  ;;  %v1118_v4 = vld [vmem:[#allocation2 + $0xf4] sm:$0xf0]  ;;  %v832_v9 = vld [vmem:[#allocation2 + $0x60] sm:$0xf] }
   0xe   :  { %v968_v5 = vld [vmem:[#allocation2 + $0x170] sm:$0xf]  ;;  %v1134_v6 = vld [vmem:[#allocation2 + $0x174] sm:$0xf0]  ;;  %v905_v7 = vor.u32 %v1118_v4, %v904_v2  ;;  %v1100_v10 = vld [vmem:[#allocation2 + $0x64] sm:$0xf0] }
   0xf   :  { %v969_v8 = vor.u32 %v1134_v6, %v968_v5  ;;  %v896_v11 = vld [vmem:[#allocation2 + $0xe0] sm:$0xf]  ;;  %359 = vmatpush.bf16.msra.mxu0 %v841_v3  ;;  %v833_v12 = vor.u32 %v1100_v10, %v832_v9  ;;  %v1116_v13 = vld [vmem:[#allocation2 + $0xe4] sm:$0xf0]  ;;  %v824_v18 = vld [vmem:[#allocation2 + $0x50] sm:$0xf] }
  0x10   :  { %v960_v14 = vld [vmem:[#allocation2 + $0x160] sm:$0xf]  ;;  %v1132_v15 = vld [vmem:[#allocation2 + $0x164] sm:$0xf0]  ;;  %372 = vmatpush.bf16.msra.mxu1 %v905_v7  ;;  %v897_v16 = vor.u32 %v1116_v13, %v896_v11  ;;  %v1098_v19 = vld [vmem:[#allocation2 + $0x54] sm:$0xf0] }
  0x11   :  { %385 = vmatpush.bf16.msra.mxu2 %v969_v8  ;;  %v961_v17 = vor.u32 %v1132_v15, %v960_v14  ;;  %v888_v20 = vld [vmem:[#allocation2 + $0xd0] sm:$0xf]  ;;  %v1114_v21 = vld [vmem:[#allocation2 + $0xd4] sm:$0xf0]  ;;  %v825_v24 = vor.u32 %v1098_v19, %v824_v18  ;;  %v1101_v25 = vld [vmem:[#allocation2 + $0x74] sm:$0xf] }
  0x12   :  { %v952_v22 = vld [vmem:[#allocation2 + $0x150] sm:$0xf]  ;;  %v1130_v23 = vld [vmem:[#allocation2 + $0x154] sm:$0xf0]  ;;  %v842_v26 = vld [vmem:[#allocation2 + $0x78] sm:$0xf0]  ;;  %v889_v27 = vor.u32 %v1114_v21, %v888_v20 }
  0x13   :  { %360 = vmatpush.bf16.msra.mxu0 %v833_v12  ;;  %v953_v28 = vor.u32 %v1130_v23, %v952_v22  ;;  %v816_v29 = vld [vmem:[#allocation2 + $0x40] sm:$0xf]  ;;  %v1096_v30 = vld [vmem:[#allocation2 + $0x44] sm:$0xf0]  ;;  %v845_v32 = vor.u32 %v1101_v25, %v842_v26  ;;  %v1099_v36 = vld [vmem:[#allocation2 + $0x64] sm:$0xf] }
  0x14   :  { %373 = vmatpush.bf16.msra.mxu1 %v897_v16  ;;  %v880_v31 = vld [vmem:[#allocation2 + $0xc0] sm:$0xf]  ;;  %v1112_v33 = vld [vmem:[#allocation2 + $0xc4] sm:$0xf0]  ;;  %v834_v37 = vld [vmem:[#allocation2 + $0x68] sm:$0xf0]  ;;  %v817_v38 = vor.u32 %v1096_v30, %v816_v29 }
  0x15   :  { %386 = vmatpush.bf16.msra.mxu2 %v961_v17  ;;  %v944_v34 = vld [vmem:[#allocation2 + $0x140] sm:$0xf]  ;;  %v1128_v35 = vld [vmem:[#allocation2 + $0x144] sm:$0xf0]  ;;  %398 = vmatpush.bf16.msra.mxu3 %v845_v32  ;;  %v808_v39 = vld [vmem:[#allocation2 + $0x30] sm:$0xf]  ;;  %v837_v41 = vor.u32 %v1099_v36, %v834_v37  ;;  %v881_v42 = vor.u32 %v1112_v33, %v880_v31 }
  0x16   :  { %v1094_v40 = vld [vmem:[#allocation2 + $0x34] sm:$0xf0]  ;;  %v945_v43 = vor.u32 %v1128_v35, %v944_v34  ;;  %v872_v44 = vld [vmem:[#allocation2 + $0xb0] sm:$0xf]  ;;  %v1097_v46 = vld [vmem:[#allocation2 + $0x54] sm:$0xf] }
  0x17   :  { %361 = vmatpush.bf16.msra.mxu0 %v825_v24  ;;  %v1110_v45 = vld [vmem:[#allocation2 + $0xb4] sm:$0xf0]  ;;  %v936_v47 = vld [vmem:[#allocation2 + $0x130] sm:$0xf]  ;;  %v826_v49 = vld [vmem:[#allocation2 + $0x58] sm:$0xf0]  ;;  %v809_v51 = vor.u32 %v1094_v40, %v808_v39 }
  0x18   :  { %374 = vmatpush.bf16.msra.mxu1 %v889_v27  ;;  %v1126_v48 = vld [vmem:[#allocation2 + $0x134] sm:$0xf0]  ;;  %v829_v50 = vor.u32 %v1097_v46, %v826_v49  ;;  %v1095_v52 = vld [vmem:[#allocation2 + $0x44] sm:$0xf]  ;;  %v818_v53 = vld [vmem:[#allocation2 + $0x48] sm:$0xf0]  ;;  %v873_v54 = vor.u32 %v1110_v45, %v872_v44 }
  0x19   :  { %387 = vmatpush.bf16.msra.mxu2 %v953_v28  ;;  %399 = vmatpush.bf16.msra.mxu3 %v837_v41  ;;  %v937_v55 = vor.u32 %v1126_v48, %v936_v47  ;;  %v800_v56 = vld [vmem:[#allocation2 + $0x20] sm:$0xf]  ;;  %v1092_v57 = vld [vmem:[#allocation2 + $0x24] sm:$0xf0]  ;;  %v821_v62 = vor.u32 %v1095_v52, %v818_v53  ;;  %v1093_v0 = vld [vmem:[#allocation2 + $0x34] sm:$0xf] }
  0x1a   :  { %v864_v58 = vld [vmem:[#allocation2 + $0xa0] sm:$0xf]  ;;  %v1108_v59 = vld [vmem:[#allocation2 + $0xa4] sm:$0xf0]  ;;  %v801_v63 = vor.u32 %v1092_v57, %v800_v56  ;;  %v810_v1 = vld [vmem:[#allocation2 + $0x38] sm:$0xf0] }
  0x1b   :  { %362 = vmatpush.bf16.msra.mxu0 %v817_v38  ;;  %v928_v60 = vld [vmem:[#allocation2 + $0x120] sm:$0xf]  ;;  %v1124_v61 = vld [vmem:[#allocation2 + $0x124] sm:$0xf0]  ;;  %v865_v2 = vor.u32 %v1108_v59, %v864_v58  ;;  %v792_v4 = vld [vmem:[#allocation2 + $0x10] sm:$0xf]  ;;  %v813_v10 = vor.u32 %v1093_v0, %v810_v1 }
  0x1c   :  { %375 = vmatpush.bf16.msra.mxu1 %v881_v42  ;;  %v929_v3 = vor.u32 %v1124_v61, %v928_v60  ;;  %v1090_v5 = vld [vmem:[#allocation2 + $0x14] sm:$0xf0]  ;;  %v856_v6 = vld [vmem:[#allocation2 + $0x90] sm:$0xf]  ;;  %v784_v12 = vld [vmem:[#allocation2] sm:$0xf] }
  0x1d   :  { %388 = vmatpush.bf16.msra.mxu2 %v945_v43  ;;  %400 = vmatpush.bf16.msra.mxu3 %v829_v50  ;;  %v1106_v7 = vld [vmem:[#allocation2 + $0x94] sm:$0xf0]  ;;  %v920_v8 = vld [vmem:[#allocation2 + $0x110] sm:$0xf]  ;;  %v793_v11 = vor.u32 %v1090_v5, %v792_v4  ;;  %v1091_v13 = vld [vmem:[#allocation2 + $0x24] sm:$0xf] }
  0x1e   :  { %v1122_v9 = vld [vmem:[#allocation2 + $0x114] sm:$0xf0]  ;;  %v802_v14 = vld [vmem:[#allocation2 + $0x28] sm:$0xf0]  ;;  %v857_v15 = vor.u32 %v1106_v7, %v856_v6  ;;  %v1088_v17 = vld [vmem:[#allocation2 + $0x4] sm:$0xf0] }
  0x1f   :  { %363 = vmatpush.bf16.msra.mxu0 %v809_v51  ;;  %v921_v16 = vor.u32 %v1122_v9, %v920_v8  ;;  %v848_v18 = vld [vmem:[#allocation2 + $0x80] sm:$0xf]  ;;  %v1104_v19 = vld [vmem:[#allocation2 + $0x84] sm:$0xf0]  ;;  %v1117_v20 = vld [vmem:[#allocation2 + $0xf4] sm:$0xf]  ;;  %v805_v26 = vor.u32 %v1091_v13, %v802_v14  ;;  %v785_v27 = vor.u32 %v1088_v17, %v784_v12 }
  0x20   :  { %376 = vmatpush.bf16.msra.mxu1 %v873_v54  ;;  %v906_v21 = vld [vmem:[#allocation2 + $0xf8] sm:$0xf0]  ;;  %v1133_v22 = vld [vmem:[#allocation2 + $0x174] sm:$0xf]  ;;  %v912_v24 = vld [vmem:[#allocation2 + $0x100] sm:$0xf]  ;;  %v849_v31 = vor.u32 %v1104_v19, %v848_v18 }
  0x21   :  { %389 = vmatpush.bf16.msra.mxu2 %v937_v55  ;;  %401 = vmatpush.bf16.msra.mxu3 %v821_v62  ;;  %v970_v23 = vld [vmem:[#allocation2 + $0x178] sm:$0xf0]  ;;  %v1120_v25 = vld [vmem:[#allocation2 + $0x104] sm:$0xf0]  ;;  %v59_v28 = vld [vmem:[%s1356_s0] sm:$0xff]  ;;  %v909_v32 = vor.u32 %v1117_v20, %v906_v21  ;;  %vm711_vm0 = vcmask 523264  }
  0x22   :  { %v1089_v29 = vld [vmem:[#allocation2 + $0x14] sm:$0xf]  ;;  %v794_v30 = vld [vmem:[#allocation2 + $0x18] sm:$0xf0]  ;;  %v60_v33 = vld [vmem:[%s1356_s0 + $0x8] sm:$0xff]  ;;  %v973_v34 = vor.u32 %v1133_v22, %v970_v23  ;;  %v913_v35 = vor.u32 %v1120_v25, %v912_v24  ;;  %v62_v41 = vpack.c.bf16 %v59_v28, %v59_v28  ;;  %vm734_vm1 = vcmask 261120  }
  0x23   :  { %364 = vmatpush.bf16.msra.mxu0 %v801_v63  ;;  %v1115_v36 = vld [vmem:[#allocation2 + $0xe4] sm:$0xf]  ;;  %v898_v37 = vld [vmem:[#allocation2 + $0xe8] sm:$0xf0]  ;;  %v61_v38 = vld [vmem:[%s1356_s0 + $0x10] sm:$0xff]  ;;  %v797_v42 = vor.u32 %v1089_v29, %v794_v30  ;;  %v1291_v43 = vpack.c.bf16 %v60_v33, %v60_v33  ;;  %vm774_vm7 = vcmask 15360  }
  0x24   :  { %377 = vmatpush.bf16.msra.mxu1 %v865_v2  ;;  %v1131_v39 = vld [vmem:[#allocation2 + $0x164] sm:$0xf]  ;;  %v962_v40 = vld [vmem:[#allocation2 + $0x168] sm:$0xf0]  ;;  %v901_v46 = vor.u32 %v1115_v36, %v898_v37  ;;  %v1293_v47 = vpack.c.bf16 %v61_v38, %v61_v38  ;;  %v1113_v49 = vld [vmem:[#allocation2 + $0xd4] sm:$0xf] }
  0x25   :  { %390 = vmatpush.bf16.msra.mxu2 %v929_v3  ;;  %402 = vmatpush.bf16.msra.mxu3 %v813_v10  ;;  %v1087_v44 = vld [vmem:[#allocation2 + $0x4] sm:$0xf]  ;;  %v786_v45 = vld [vmem:[#allocation2 + $0x8] sm:$0xf0]  ;;  %v965_v48 = vor.u32 %v1131_v39, %v962_v40  ;;  %v890_v50 = vld [vmem:[#allocation2 + $0xd8] sm:$0xf0] }
  0x26   :  { %v1142_v51 = vld [vmem:[#allocation4 + $0x38] sm:$0xff]  ;;  %v1129_v52 = vld [vmem:[#allocation2 + $0x154] sm:$0xf]  ;;  %v789_v54 = vor.u32 %v1087_v44, %v786_v45  ;;  %v893_v56 = vor.u32 %v1113_v49, %v890_v50  ;;  %v1111_v58 = vld [vmem:[#allocation2 + $0xc4] sm:$0xf] }
  0x27   :  { %365 = vmatpush.bf16.msra.mxu0 %v793_v11  ;;  %v954_v53 = vld [vmem:[#allocation2 + $0x158] sm:$0xf0]  ;;  %v1141_v55 = vld [vmem:[#allocation4 + $0x30] sm:$0xff]  ;;  %v882_v59 = vld [vmem:[#allocation2 + $0xc8] sm:$0xf0] }
  0x28   :  { %378 = vmatpush.bf16.msra.mxu1 %v857_v15  ;;  %v957_v57 = vor.u32 %v1129_v52, %v954_v53  ;;  %v1127_v60 = vld [vmem:[#allocation2 + $0x144] sm:$0xf]  ;;  %v946_v61 = vld [vmem:[#allocation2 + $0x148] sm:$0xf0]  ;;  %v885_v63 = vor.u32 %v1111_v58, %v882_v59  ;;  %v1109_v1 = vld [vmem:[#allocation2 + $0xb4] sm:$0xf] }
  0x29   :  { %391 = vmatpush.bf16.msra.mxu2 %v921_v16  ;;  %403 = vmatpush.bf16.msra.mxu3 %v805_v26  ;;  %v1140_v62 = vld [vmem:[#allocation4 + $0x28] sm:$0xff]  ;;  %v949_v0 = vor.u32 %v1127_v60, %v946_v61  ;;  %v874_v2 = vld [vmem:[#allocation2 + $0xb8] sm:$0xf0]  ;;  %v1125_v3 = vld [vmem:[#allocation2 + $0x134] sm:$0xf] }
  0x2a   :  { %v938_v4 = vld [vmem:[#allocation2 + $0x138] sm:$0xf0]  ;;  %v1139_v5 = vld [vmem:[#allocation4 + $0x20] sm:$0xff]  ;;  %v877_v6 = vor.u32 %v1109_v1, %v874_v2  ;;  %v866_v9 = vld [vmem:[#allocation2 + $0xa8] sm:$0xf0] }
  0x2b   :  { %366 = vmatpush.bf16.msra.mxu0 %v785_v27  ;;  %v941_v7 = vor.u32 %v1125_v3, %v938_v4  ;;  %v1107_v8 = vld [vmem:[#allocation2 + $0xa4] sm:$0xf]  ;;  %v930_v11 = vld [vmem:[#allocation2 + $0x128] sm:$0xf0]  ;;  %v1138_v12 = vld [vmem:[#allocation4 + $0x18] sm:$0xff] }
  0x2c   :  { %379 = vmatpush.bf16.msra.mxu1 %v849_v31  ;;  %v1123_v10 = vld [vmem:[#allocation2 + $0x124] sm:$0xf]  ;;  %v869_v13 = vor.u32 %v1107_v8, %v866_v9  ;;  %v1105_v15 = vld [vmem:[#allocation2 + $0x94] sm:$0xf]  ;;  %v858_v16 = vld [vmem:[#allocation2 + $0x98] sm:$0xf0] }
  0x2d   :  { %392 = vmatpush.bf16.msra.mxu2 %v913_v35  ;;  %404 = vmatpush.bf16.msra.mxu3 %v797_v42  ;;  %v933_v14 = vor.u32 %v1123_v10, %v930_v11  ;;  %v1121_v17 = vld [vmem:[#allocation2 + $0x114] sm:$0xf]  ;;  %v922_v18 = vld [vmem:[#allocation2 + $0x118] sm:$0xf0]  ;;  %v861_v19 = vor.u32 %v1105_v15, %v858_v16  ;;  %v1103_v21 = vld [vmem:[#allocation2 + $0x84] sm:$0xf] }
  0x2e   :  { %367 = vmatmul.bf16.vlgmr.msra.gmra.mxu0 %v62_v41  ;;  %v925_v20 = vor.u32 %v1121_v17, %v922_v18  ;;  %v850_v22 = vld [vmem:[#allocation2 + $0x88] sm:$0xf0]  ;;  %v1119_v23 = vld [vmem:[#allocation2 + $0x104] sm:$0xf]  ;;  %v1137_v27 = vld [vmem:[#allocation4 + $0x10] sm:$0xff] }
  0x2f   :  { %411 = vmatpush.bf16.msrb.mxu0 %v909_v32  ;;  %380 = vmatmul.bf16.vlgmr.msra.gmra.mxu1 %v1291_v43  ;;  %v914_v24 = vld [vmem:[#allocation2 + $0x108] sm:$0xf0]  ;;  %v853_v25 = vor.u32 %v1103_v21, %v850_v22  ;;  %v1150_v28 = vld [vmem:[#allocation4 + $0x78] sm:$0xff]  ;;  %v1149_v30 = vld [vmem:[#allocation4 + $0x70] sm:$0xff] }
  0x30   :  { %424 = vmatpush.bf16.msrb.mxu1 %v973_v34  ;;  %393 = vmatmul.bf16.vlgmr.msra.gmra.mxu2 %v1293_v47  ;;  %v917_v26 = vor.u32 %v1119_v23, %v914_v24  ;;  %v1136_v29 = vld [vmem:[#allocation4 + $0x8] sm:$0xff]  ;;  %v1135_v31 = vld [vmem:[#allocation4] sm:$0xff]  ;;  %v1146_v34 = vld [vmem:[#allocation4 + $0x58] sm:$0xff] }
  0x31   :  { %570 = vmatpush.bf16.msrb.mxu2 %v1142_v51  ;;  %405 = vmatpush.bf16.msra.mxu3 %v789_v54  ;;  %v1148_v32 = vld [vmem:[#allocation4 + $0x68] sm:$0xff]  ;;  %v1147_v33 = vld [vmem:[#allocation4 + $0x60] sm:$0xff]  ;;  %v1145_v35 = vld [vmem:[#allocation4 + $0x50] sm:$0xff] }
  0x32   :  { %v65_v36 = vld [vmem:[%s1362_s6] ss:$8 sm:$0x3]  ;;  %v1158_v44 = vld [vmem:[%s1359_s3 + $0x38] sm:$0xff]  ;;  %v1153_v4 = vld [vmem:[%s1359_s3 + $0x10] sm:$0xff] }
  0x33   :  { %412 = vmatpush.bf16.msrb.mxu0 %v901_v46  ;;  %v115_v37 = vperm.slane %v65_v36, 0  ;;  %v1144_v38 = vld [vmem:[#allocation4 + $0x48] sm:$0xff]  ;;  %v1143_v42 = vld [vmem:[#allocation4 + $0x40] sm:$0xff]  ;;  %v116_v54 = vperm.slane %v65_v36, 1  ;;  %v1154_v3 = vld [vmem:[%s1359_s3 + $0x18] sm:$0xff] }
  0x34   :  { %425 = vmatpush.bf16.msrb.mxu1 %v965_v48  ;;  %406 = vmatmul.bf16.vlgmr.msra.gmra.mxu3 %v62_v41  ;;  %v1156_v1 = vld [vmem:[%s1359_s3 + $0x28] sm:$0xff]  ;;  %v1155_v2 = vld [vmem:[%s1359_s3 + $0x20] sm:$0xff]  ;;  %v1161_v9 = vld [vmem:[%s1360_s4 + $0x10] sm:$0xff] }
  0x35   :  { %571 = vmatpush.bf16.msrb.mxu2 %v1141_v55  ;;  %583 = vmatpush.bf16.msrb.mxu3 %v1150_v28  ;;  %v1160_v10 = vld [vmem:[%s1360_s4 + $0x8] sm:$0xff] }
  0x37   :  { %413 = vmatpush.bf16.msrb.mxu0 %v893_v56 }
  0x38   :  { %426 = vmatpush.bf16.msrb.mxu1 %v957_v57 }
  0x39   :  { %572 = vmatpush.bf16.msrb.mxu2 %v1140_v62  ;;  %584 = vmatpush.bf16.msrb.mxu3 %v1149_v30 }
  0x3b   :  { %414 = vmatpush.bf16.msrb.mxu0 %v885_v63 }
  0x3c   :  { %427 = vmatpush.bf16.msrb.mxu1 %v949_v0  ;;  %v1157_v0 = vld [vmem:[%s1359_s3 + $0x30] sm:$0xff] }
  0x3d   :  { %573 = vmatpush.bf16.msrb.mxu2 %v1139_v5  ;;  %585 = vmatpush.bf16.msrb.mxu3 %v1148_v32  ;;  %v1152_v5 = vld [vmem:[%s1359_s3 + $0x8] sm:$0xff] }
  0x3f   :  { %415 = vmatpush.bf16.msrb.mxu0 %v877_v6  ;;  %v1151_v6 = vld [vmem:[%s1359_s3] sm:$0xff] }
  0x40   :  { %428 = vmatpush.bf16.msrb.mxu1 %v941_v7  ;;  %v1162_v7 = vld [vmem:[%s1360_s4 + $0x18] sm:$0xff] }
  0x41   :  { %574 = vmatpush.bf16.msrb.mxu2 %v1138_v12  ;;  %586 = vmatpush.bf16.msrb.mxu3 %v1147_v33  ;;  %v441_v12 = vld [vmem:[%s1362_s6 + $0x1] ss:$0 sm:$0xff] }
  0x43   :  { %416 = vmatpush.bf16.msrb.mxu0 %v869_v13 }
  0x44   :  { %429 = vmatpush.bf16.msrb.mxu1 %v933_v14 }
  0x45   :  { %575 = vmatpush.bf16.msrb.mxu2 %v1137_v27  ;;  %587 = vmatpush.bf16.msrb.mxu3 %v1146_v34  ;;  %v1235_v34 = vmov 0  }
  0x46   :  { %1171 = vset.pattern.permute.xlu1 %v1235_v34  ;;  %1170 = vset.pattern.permute.xlu0 %v1235_v34 }
  0x47   :  { %417 = vmatpush.bf16.msrb.mxu0 %v861_v19  ;;  %v1159_v19 = vld [vmem:[%s1360_s4] sm:$0xff] }
  0x48   :  { %430 = vmatpush.bf16.msrb.mxu1 %v925_v20  ;;  %v598_v20 = vld [vmem:[%s1362_s6 + $0x2] ss:$0 sm:$0xff] }
  0x49   :  { %576 = vmatpush.bf16.msrb.mxu2 %v1136_v29  ;;  %588 = vmatpush.bf16.msrb.mxu3 %v1145_v35  ;;  %v1172_v29 = vld [vmem:[%s1361_s5] ss:$0 sm:$0xff]  ;;  %v738_v35 = vld [vmem:[%s1362_s6 + $0x4] ss:$0 sm:$0xff] }
  0x4b   :  { %418 = vmatpush.bf16.msrb.mxu0 %v853_v25 }
  0x4c   :  { %431 = vmatpush.bf16.msrb.mxu1 %v917_v26  ;;  %v678_v26 = vld [vmem:[%s1362_s6 + $0x3] ss:$0 sm:$0xff] }
  0x4d   :  { %577 = vmatpush.bf16.msrb.mxu2 %v1135_v31  ;;  %589 = vmatpush.bf16.msrb.mxu3 %v1144_v38 }
  0x4e   :  { %419 = vmatmul.bf16.vlgmr.msrb.gmra.mxu0 %v1291_v43 }
  0x4f   :  { %432 = vmatmul.bf16.vlgmr.msrb.gmra.mxu1 %v1293_v47  ;;  %663 = vmatpush.bf16.msra.mxu0 %v1158_v44 }
  0x50   :  { %719 = vmatpush.bf16.msra.mxu1 %v1162_v7 }
  0x51   :  { %590 = vmatpush.bf16.msrb.mxu3 %v1143_v42 }
  0x53   :  { %664 = vmatpush.bf16.msra.mxu0 %v1157_v0 }
  0x54   :  { %720 = vmatpush.bf16.msra.mxu1 %v1161_v9 }
  0x57   :  { %665 = vmatpush.bf16.msra.mxu0 %v1156_v1 }
  0x58   :  { %721 = vmatpush.bf16.msra.mxu1 %v1160_v10 }
  0x5b   :  { %666 = vmatpush.bf16.msra.mxu0 %v1155_v2 }
  0x5c   :  { %722 = vmatpush.bf16.msra.mxu1 %v1159_v19 }
  0x5f   :  { %667 = vmatpush.bf16.msra.mxu0 %v1154_v3 }
  0x63   :  { %668 = vmatpush.bf16.msra.mxu0 %v1153_v4 }
  0x67   :  { %669 = vmatpush.bf16.msra.mxu0 %v1152_v5 }
  0x6b   :  { %670 = vmatpush.bf16.msra.mxu0 %v1151_v6 }
  0xab   :  { %v368_v39 = vpop.f32.mrf.mxu0 }
  0xac   :  { %v369_v40 = vadd.f32 %v368_v39, %v115_v37  ;;  %v381_v41 = vpop.f32.mrf.mxu1 }
  0xae   :  { %v382_v43 = vadd.f32 %v381_v41, %v369_v40 }
  0xb3   :  { %v394_v45 = vpop.f32.mrf.mxu2  ;;  %v370_v46 = vpop.f32.mrf.mxu0 }
  0xb4   :  { %v395_v47 = vadd.f32 %v394_v45, %v382_v43  ;;  %v383_v48 = vpop.f32.mrf.mxu1 }
  0xb6   :  { %v437_v49 = vmax.f32 %v395_v47, 0.0 }
  0xb7   :  { %v407_v51 = vpop.f32.mrf.mxu3 }
  0xb8   :  { %v439_v50 = vpack.c.bf16 %v437_v49, %v437_v49  ;;  %v408_v55 = vadd.f32 %v407_v51, %v116_v54 }
  0xba   :  { %578 = vmatmul.bf16.vlgmr.msrb.gmra.mxu2 %v439_v50 }
  0xbb   :  { %v396_v52 = vpop.f32.mrf.mxu2 }
  0xbf   :  { %v409_v53 = vpop.f32.mrf.mxu3 }
  0xc0   :  { %v760_v53 = vlaneseq }
  0xc2   :  { %v761_v54 = vand.u32 127, %v760_v53 }
  0xc4   :  { %vm762_vm6 = vcmp.eq.s32.totalorder %v761_v54, 0 }
  0xcb   :  { %v420_v56 = vpop.f32.mrf.mxu0 }
  0xcc   :  { %v421_v57 = vadd.f32 %v420_v56, %v408_v55  ;;  %v433_v58 = vpop.f32.mrf.mxu1 }
  0xce   :  { %v434_v59 = vadd.f32 %v433_v58, %v421_v57 }
  0xd0   :  { %v438_v60 = vmax.f32 %v434_v59, 0.0 }
  0xd2   :  { %v440_v61 = vpack.c.bf16 %v438_v60, %v438_v60 }
  0xd3   :  { %v422_v62 = vpop.f32.mrf.mxu0 }
  0xd4   :  { %v435_v63 = vpop.f32.mrf.mxu1  ;;  %591 = vmatmul.bf16.vlgmr.msrb.gmra.mxu3 %v440_v61 }
 0x13d   :  { %v579_v8 = vpop.f32.mrf.mxu2 }
 0x13e   :  { %v580_v13 = vadd.f32 %v579_v8, %v441_v12 }
 0x145   :  { %v581_v11 = vpop.f32.mrf.mxu2 }
 0x157   :  { %v592_v14 = vpop.f32.mrf.mxu3 }
 0x158   :  { %v593_v15 = vadd.f32 %v592_v14, %v580_v13 }
 0x15a   :  { %v596_v16 = vmax.f32 %v593_v15, 0.0 }
 0x15c   :  { %v597_v17 = vpack.c.bf16 %v596_v16, %v596_v16 }
 0x15e   :  { %671 = vmatmul.bf16.vlgmr.msra.gmra.mxu0 %v597_v17 }
 0x15f   :  { %v594_v18 = vpop.f32.mrf.mxu3 }
 0x1db   :  { %v672_v21 = vpop.f32.mrf.mxu0 }
 0x1dc   :  { %v673_v22 = vadd.f32 %v672_v21, %v598_v20 }
 0x1de   :  { %v676_v23 = vmax.f32 %v673_v22, 0.0 }
 0x1e0   :  { %v677_v24 = vpack.c.bf16 %v676_v23, %v676_v23 }
 0x1e2   :  { %1086 = vmatmul.msk.bf16.vlgmr.msra.gmra.mxu1 %vm711_vm0, %v677_v24 }
 0x1e3   :  { %v674_v25 = vpop.f32.mrf.mxu0 }
 0x25f   :  { %v724_v27 = vpop.f32.mrf.mxu1 }
 0x260   :  { %v725_v28 = vadd.f32 %v724_v27, %v678_v26 }
 0x262   :  { %v728_v30 = vmax.f32 %v725_v28, 0.0 }
 0x264   :  { %v733_v31 = vmul.f32 %v1172_v29, %v728_v30 }
 0x266   :  { %v735_v32 = vsel %vm734_vm1, %v733_v31, 0.0 }
 0x267   :  { %v726_v33 = vpop.f32.mrf.mxu1  ;;  %736 = vadd.xlane.f32.xlu0 %v735_v32 }
 0x2da   :  { %v737_v36 = vpop.xlane.xlu0 %736 }
 0x2db   :  { %v739_v37 = vadd.f32 %v738_v35, %v737_v36 }
 0x2dd   :  { %v740_v38 = vsub.f32 0.0, %v739_v37 }
 0x2df   :  { %v741_v39 = vmul.f32 1.442695, %v740_v38 }
 0x2e1   :  { %1173 = vpow2.f32 %v741_v39 }
 0x2e7   :  { %v1174_v40 = vpop.eup %1173 }
 0x2e8   :  { %v743_v41 = vadd.f32 1.0, %v1174_v40 }
 0x2ea   :  { %1175 = vrcp.f32 %v743_v41  ;;  %v755_v45 = vand.u32 2147483648, %v743_v41  ;;  %v753_v47 = vand.u32 2147483647, %v743_v41  ;;  %vm749_vm3 = vweird.f32 %v743_v41 }
 0x2ec   :  { %v756_v49 = vor.u32 1.1754944e-38, %v755_v45  ;;  %vm754_vm5 = vcmp.eq.f32.partialorder %v753_v47, 8.507059e+37 }
 0x2f0   :  { %v1176_v42 = vpop.eup %1175 }
 0x2f1   :  { %v745_v43 = vmul.f32 %v1176_v42, %v743_v41  ;;  %vm750_vm2 = vweird.f32 %v1176_v42 }
 0x2f2   :  { %vm751_vm4 = vmor %vm749_vm3, %vm750_vm2 }
 0x2f3   :  { %v746_v44 = vsub.f32 1.0, %v745_v43 }
 0x2f5   :  { %v747_v46 = vmul.f32 %v1176_v42, %v746_v44 }
 0x2f7   :  { %v748_v48 = vadd.f32 %v1176_v42, %v747_v46 }
 0x2f9   :  { %v752_v50 = vsel %vm751_vm4, %v1176_v42, %v748_v48 }
 0x2fa   :  { %v757_v51 = vsel %vm754_vm5, %v756_v49, %v752_v50 }
 0x2fb   :  { %770 = vperm.xlu1 %1171, %v757_v51   ;;  %v759_v52 = vsub.f32 1.0, %v757_v51 }
 0x2fd   :  { %765 = vperm.xlu0 %1170, %v759_v52  }
 0x36d   :  { %v771_v55 = vpop.permute.xlu1 %770 }
 0x36f   :  { %v766_v56 = vpop.permute.xlu0 %765 }
 0x370   :  { %v773_v57 = vsel %vm762_vm6, %v766_v56, %v771_v55 }
 0x371   :  { %775 = vst.msk [vmem:[%s1363_s7] sm:$0xff] %vm774_vm7, %v773_v57 }
 0x372   :  { %780 = vsyncpa [#allocation3], 1 }
 0x373   :  { %781 = vsyncpa [#allocation5], 1 }

</bundles_post_ra>
